<compile_context>
chip_gen: v6e
topology: v6e:2x2x1
jax: 0.10.0
libtpu: 0.0.40
codegen_flags: <defaults>
</compile_context>

<pallas_src>
import jax
import jax.numpy as jnp
from jax.experimental import pallas as pl
from jax.experimental.pallas import tpu as pltpu

# Deterministic "config": ImageNet RGB stats (cfg.DATA_LOADER.MEAN / STD),
# BGR=False so no channel reversal.
_MEAN = (0.485, 0.456, 0.406)
_STD = (0.229, 0.224, 0.225)
_BGR = False


def _normalize_kernel(x_ref, scale_ref, bias_ref, o_ref):
    # x_ref:     (nb, 1, H, W) tile in VMEM
    # scale_ref: (C,) f32 in SMEM  (1/std per channel)
    # bias_ref:  (C,) f32 in SMEM  (-mean/std per channel)
    c = pl.program_id(0)
    s = scale_ref[c]                      # scalar -> vreg splat (free VPU slot)
    b = bias_ref[c]
    x = x_ref[...].astype(jnp.float32)
    o_ref[...] = (x * s + b).astype(o_ref.dtype)


def _vmem_capacity_bytes() -> int:
    try:
        return int(pltpu.get_tpu_info().vmem_capacity_bytes)
    except Exception:
        return 64 << 20  # conservative (v7x per-TC) fallback


def _choose_batch_tile(n: int, c: int, bytes_per_image: int, target: int) -> int:
    """Pick a batch tile so one (nb, 1, H, W) buffer stays under `target` bytes."""
    nb = max(1, min(n, target // max(bytes_per_image, 1)))
    # Prefer a tile that divides N exactly (no ragged last block).
    for cand in range(nb, 0, -1):
        if n % cand == 0:
            nb = cand
            break
    # Guarantee grid length >= 2 where possible (keep v7x's second TC busy).
    if c * (-(-n // nb)) < 2 and n > 1:
        nb = (n + 1) // 2
    return nb


def normalize_layer(x: jax.Array) -> jax.Array:
    """(x - mean[c]) / std[c] over NCHW input, per-channel broadcast."""
    N, C, H, W = x.shape

    # Folded scale/bias in float32 regardless of x.dtype.
    mean = jnp.asarray(_MEAN[::-1] if _BGR else _MEAN, dtype=jnp.float32)
    std = jnp.asarray(_STD[::-1] if _BGR else _STD, dtype=jnp.float32)
    assert mean.shape == (C,), f"expected {C} channels, got {mean.shape}"

    scale = 1.0 / std                     # (C,) f32
    bias = -mean / std                    # (C,) f32

    itemsize = x.dtype.itemsize
    bytes_per_image = H * W * itemsize    # one (1, 1, H, W) slab

    # Generation-aware per-buffer budget: ~4 MiB on 64 MiB-VMEM parts (v7x),
    # ~8 MiB on 128 MiB parts (v5e / v6e).
    vmem_cap = _vmem_capacity_bytes()
    per_buf_target = (4 << 20) if vmem_cap <= (64 << 20) else (8 << 20)

    nb = _choose_batch_tile(N, C, bytes_per_image, per_buf_target)
    n_blocks = -(-N // nb)
    grid = (C, n_blocks)

    # Exact footprint: in + out tiles, double-buffered, plus headroom. SMEM
    # scale/bias are negligible. Cap well under physical VMEM per generation.
    tile_bytes = nb * bytes_per_image
    vmem_cap_limit = (36 << 20) if vmem_cap <= (64 << 20) else (64 << 20)
    vmem_limit = min(max(4 * tile_bytes + (2 << 20), 16 << 20), vmem_cap_limit)

    total_elems = N * C * H * W
    cost = pl.CostEstimate(
        flops=2 * total_elems,            # one mul + one add per element
        transcendentals=0,
        bytes_accessed=2 * total_elems * itemsize,
    )

    x_spec = pl.BlockSpec((nb, 1, H, W), lambda c, n: (n, c, 0, 0))
    smem_spec = pl.BlockSpec(memory_space=pltpu.MemorySpace.SMEM)

    out = pl.pallas_call(
        _normalize_kernel,
        out_shape=jax.ShapeDtypeStruct((N, C, H, W), x.dtype),
        grid=grid,
        in_specs=[x_spec, smem_spec, smem_spec],
        out_specs=pl.BlockSpec((nb, 1, H, W), lambda c, n: (n, c, 0, 0)),
        compiler_params=pltpu.CompilerParams(
            dimension_semantics=("parallel", "parallel"),
            vmem_limit_bytes=vmem_limit,
        ),
        cost_estimate=cost,
    )(x, scale, bias)

    return out


if __name__ == "__main__":
    key = jax.random.PRNGKey(0)
    # Small image batch consistent with TF.normalize usage: NCHW, 3 channels.
    x = jax.random.uniform(key, (2, 3, 16, 16), dtype=jnp.float32)

    out = normalize_layer(x)
    out = jax.block_until_ready(out)

    # Pure-JAX reference check.
    mean = jnp.asarray(_MEAN, dtype=jnp.float32).reshape(1, 3, 1, 1)
    std = jnp.asarray(_STD, dtype=jnp.float32).reshape(1, 3, 1, 1)
    ref = ((x.astype(jnp.float32) - mean) / std).astype(x.dtype)
    assert out.shape == x.shape and out.dtype == x.dtype
    assert jnp.allclose(out, ref, atol=1e-5, rtol=1e-5)

    print("KERNEL_OK")
</pallas_src>

<mosaic_0001>
module attributes {stable_mosaic.version = 11 : i64} {
  func.func @_normalize_kernel(%arg0: i32, %arg1: i32, %arg2: memref<2x1x16x16xf32, #tpu.memory_space<vmem>>, %arg3: memref<3xf32, #tpu.memory_space<smem>>, %arg4: memref<3xf32, #tpu.memory_space<smem>>, %arg5: memref<2x1x16x16xf32, #tpu.memory_space<vmem>>) attributes {dimension_semantics = [#tpu.dimension_semantics<parallel>, #tpu.dimension_semantics<parallel>], iteration_bounds = array<i64: 3, 1>, scalar_prefetch = 0 : i64, scratch_operands = 0 : i64, tpu.core_type = #tpu.core_type<tc>, window_params = [{transform_indices = @transform_0, window_bounds = array<i64: 2, 1, 16, 16>}, {transform_indices = @transform_1, window_bounds = array<i64: 3>}, {transform_indices = @transform_2, window_bounds = array<i64: 3>}, {transform_indices = @transform_3, window_bounds = array<i64: 2, 1, 16, 16>}]} {
    %0 = arith.index_cast %arg0 : i32 to index
    %1 = memref.load %arg3[%0] : memref<3xf32, #tpu.memory_space<smem>>
    %2 = arith.index_cast %arg0 : i32 to index
    %3 = memref.load %arg4[%2] : memref<3xf32, #tpu.memory_space<smem>>
    %c0 = arith.constant 0 : index
    %c0_0 = arith.constant 0 : index
    %c0_1 = arith.constant 0 : index
    %c0_2 = arith.constant 0 : index
    %4 = vector.load %arg2[%c0, %c0_0, %c0_1, %c0_2] : memref<2x1x16x16xf32, #tpu.memory_space<vmem>>, vector<2x1x16x16xf32>
    %5 = vector.broadcast %1 : f32 to vector<2x1x16x16xf32>
    %6 = arith.mulf %4, %5 : vector<2x1x16x16xf32>
    %7 = vector.broadcast %3 : f32 to vector<2x1x16x16xf32>
    %8 = arith.addf %6, %7 : vector<2x1x16x16xf32>
    %c0_3 = arith.constant 0 : index
    %c0_4 = arith.constant 0 : index
    %c0_5 = arith.constant 0 : index
    %c0_6 = arith.constant 0 : index
    %9 = vector.load %arg5[%c0_3, %c0_4, %c0_5, %c0_6] : memref<2x1x16x16xf32, #tpu.memory_space<vmem>>, vector<2x1x16x16xf32>
    tpu.vector_store %arg5[%c0_3, %c0_4, %c0_5, %c0_6], %8 {strides = array<i32>} : memref<2x1x16x16xf32, #tpu.memory_space<vmem>>, vector<2x1x16x16xf32>,
    return
  }
  func.func @transform_0(%arg0: i32, %arg1: i32) -> (i32, i32, i32, i32) {
    %c0_i32 = arith.constant 0 : i32
    %c0_i32_0 = arith.constant 0 : i32
    %c0_i32_1 = arith.constant 0 : i32
    return %arg1, %arg0, %c0_i32, %c0_i32_0 : i32, i32, i32, i32
  }
  func.func @transform_1(%arg0: i32, %arg1: i32) -> i32 {
    %c0_i32 = arith.constant 0 : i32
    %c0_i32_0 = arith.constant 0 : i32
    return %c0_i32 : i32
  }
  func.func @transform_2(%arg0: i32, %arg1: i32) -> i32 {
    %c0_i32 = arith.constant 0 : i32
    %c0_i32_0 = arith.constant 0 : i32
    return %c0_i32 : i32
  }
  func.func @transform_3(%arg0: i32, %arg1: i32) -> (i32, i32, i32, i32) {
    %c0_i32 = arith.constant 0 : i32
    %c0_i32_0 = arith.constant 0 : i32
    %c0_i32_1 = arith.constant 0 : i32
    return %arg1, %arg0, %c0_i32, %c0_i32_0 : i32, i32, i32, i32
  }
}

</mosaic_0001>

<bundles_post_ra>
// kernel: tpu_custom_call.1
= control target key start
LH: loop header
LB: loop body
LE: loop exit
PB: predicated region body
PF: predicated region fallthrough
CT: control target
= control target key end

     0   :  { %s866_s0 = inlined_call_operand.hbm [shape: f32[2,3,16,16], index: 0, kind: input, shape index: {}]   ;;  %s867_s1 = inlined_call_operand.vmem [shape: f32[3], index: 1, kind: input, shape index: {}]   ;;  %s868_s2 = inlined_call_operand.vmem [shape: f32[3], index: 2, kind: input, shape index: {}]   ;;  %s869_s3 = inlined_call_operand.hbm [shape: f32[2,3,16,16], index: 3, kind: output, shape index: {}]  }
   0x1   :  { %876 = sst [smem:[#allocation19_spill]] %s867_s1 }
   0x2   :  { %8 = vsyncpa [#allocation3], 0 }
   0x3   :  { %10 = vsyncpa [#allocation3 + $0x1], 0 }
   0x4   :  { %11 = vsyncpa [#allocation5], 0 }
   0x5   :  { %12 = vsyncpa [#allocation8], 0 }
   0x6   :  { %13 = vsyncpa [#allocation4], 0 }
   0x7   :  { %15 = vsyncpa [#allocation4 + $0x1], 0  ;;  %s688_s12 = smov 0   ;;  %s690_s13 = smov 0  }
   0x8   :  { %s692_s14 = smov 0   ;;  %s694_s15 = smov 0  }
   0x9   :  { %s696_s16 = smov 0   ;;  %s698_s17 = smov 0  }
   0xa LB: > { %s432_s18 = sadd.s32 4294967295, %s651_s17   ;;  %s433_s19 = sadd.s32 4294967294, %s651_s17   ;;  %s651_s17 = sphi %s698_s17, %s21_s17   ;;  %s647_s16 = sphi %s696_s16, %s895_s16   ;;  %s643_s15 = sphi %s694_s15, %s894_s15   ;;  %s639_s14 = sphi %s692_s14, %s893_s14   ;;  %s635_s13 = sphi %s690_s13, %s892_s13   ;;  %s631_s12 = sphi %s688_s12, %s891_s12  }
   0xb   : > { %s33_s20 = sadd.s32 1, %s647_s16  ;;  %s42_s21 = sadd.s32 1, %s639_s14 }
   0xc   : > { %p35_p0 = scmp.ge.s32.totalorder %s33_s20, 3  ;;  %p49_p1 = scmp.ne.s32.totalorder %s639_s14, %s635_s13 }
   0xd   : > { %p50_p2 = scmp.eq.s32.totalorder %s651_s17, 0  ;;  %p55_p3 = scmp.ne.s32.totalorder %s635_s13, %s631_s12 }
   0xe   : > { %s897_s20 = smov (%p35_p0, %s33_s20), 0  ;;  %p733_p5 = scmp.eq.s32.totalorder %s432_s18, 0 }
   0xf   : > { %p729_p4 = por %p50_p2, %p49_p1  ;;  %s38_s24 = ssub.s32 %s647_s16, %s897_s20 }
  0x10   : > { %s878_s23 = scalar_select %p733_p5, 1, 0 }
  0x11   : > { %s877_s22 = scalar_select %p729_p4, 1, 0 }
  0x12   : > { %p123_p6 = scmp.eq.s32.totalorder %s432_s18, 2  ;;  %p40_p7 = scmp.eq.s32.totalorder %s38_s24, 0 }
  0x13   : > { %p741_p8 = por %p733_p5, %p55_p3  ;;  %p129_p10 = scmp.eq.s32.totalorder %s433_s19, 2 }
  0x14   : > { %p745_p9 = por %p123_p6, %p49_p1  ;;  %p434_p12 = scmp.ge.s32.totalorder %s651_s17, 1 }
  0x15   : > { %s879_s25 = scalar_select %p741_p8, 1, 0 }
  0x16   : > { %s880_s26 = scalar_select %p745_p9, 1, 0 }
  0x17   : > { %s750_s27 = scalar_select %p40_p7, %s639_s14, %s42_s21  }
  0x18   : > { %p752_p11 = por %p129_p10, %p55_p3  ;;  %p136_p13 = scmp.lt.s32.totalorder %s651_s17, 4 }
  0x19   : > { %s883_s1 = sld [smem:[#allocation19_spill]]  ;;  %s160_s8 = sshll.u32 %s868_s2, 4  ;;  %s161_s8 = int_to_ptr.vmem [resolvable:$true] %s160_s8 }
  0x1a   : > { %s881_s28 = scalar_select %p752_p11, 1, 0 }
  0x1b   : > { %p758_p0 = pnand %p434_p12, %p136_p13 }
  0x1d   : > { %s882_s29 = scalar_select %p758_p0, 1, 0 }
  0x1e   : > { %p480_p1 = pneg %p758_p0 }
  0x1f   : > { %s149_s5 = sshll.u32 %s883_s1, 4  ;;  %s150_s5 = int_to_ptr.vmem [resolvable:$true] %s149_s5 }
  0x20   : > { %p772_p2 = pnand %p480_p1, %p733_p5  ;;  %s559_s10 = scalar_lea.vmem %s150_s5, 16 }
  0x21   : > { %p560_p3 = scmp.ne.s32.totalorder %s150_s5, %s559_s10  ;;  %p567_p12 = scmp.lt.s32.totalorder %s150_s5, %s150_s5 }
  0x22   : > { %p561_p6 = pneg %p772_p2  ;;  %p568_p13 = scmp.lt.s32.totalorder %s559_s10, %s559_s10 }
  0x24   : > { %p562_p7 = pnand %p561_p6, %p560_p3  ;;  %p569_p11 = por %p568_p13, %p567_p12 }
  0x26   : > { %p563_p10 = pneg %p562_p7 }
  0x28   : > { %p570_p9 = pnand %p569_p11, %p563_p10 }
  0x2a   : > { %573 = shalt.err (!%p570_p9)
}
  0x2b   : > { %s653_s11 = smov [#allocation6]   ;;  %s574_s18 = scalar_lea.vmem %s161_s8, 16 }
  0x2c   : > { %483 = dma.vmem_to_smem (!%p772_p2), %s150_s5, 16, %s653_s11, [#allocation5]  }
  0x2d   : > { %p575_p1 = scmp.ne.s32.totalorder %s161_s8, %s574_s18  ;;  %p582_p0 = scmp.lt.s32.totalorder %s161_s8, %s161_s8 }
  0x2e   : > { %p583_p4 = scmp.lt.s32.totalorder %s574_s18, %s574_s18 }
  0x2f   : > { %p577_p5 = pnand %p575_p1, %p561_p6 }
  0x30   : > { %p584_p3 = por %p583_p4, %p582_p0 }
  0x31   : > { %p578_p8 = pneg %p577_p5 }
  0x33   : > { %p585_p7 = pnand %p584_p3, %p578_p8 }
  0x35   : > { %588 = shalt.err (!%p585_p7)
}
  0x36   : > { %s654_s19 = smov [#allocation7]   ;;  %p437_p11 = scmp.ge.s32.totalorder %s651_s17, 3 }
  0x37   : > { %486 = dma.vmem_to_smem (!%p772_p2), %s161_s8, 16, %s654_s19, [#allocation8]  }
  0x38   : > { %167 = sbr.rel (%p437_p11) target bundleno = 76 (0x4c), region = 24 }
  0x3d   : > { %s171_s21 = sand.u32 1, %s639_s14   ;;  %s453_s24 = sshll.u32 %s647_s16, 8 }
  0x3e   : > { %s438_s30 = sshll.u32 %s171_s21, 5  ;;  %s184_s6 = scalar_lea.hbm %s866_s0, %s453_s24 }
  0x3f   : > { %p885_p4 = scmp.ne.s32.totalorder %s877_s22, 0  ;;  %s175_s8 = scalar_lea.vmem [#allocation2], %s438_s30 }
  0x40   : > { %s197_s9 = sshll.u32 %s175_s8, 4  ;;  %s655_s11 = smov 768   ;;  %s198_s9 = int_to_ptr.vmem [resolvable:$true] %s197_s9 }
  0x41   : > { %s459_s7 = scalar_select %p885_p4, [#allocation0], [#allocation14] }
  0x42   : > { %460 = sst [smem:[#allocation11]] (%p885_p4), %s655_s11  ;;  %s656_s18 = smov 256  }
  0x43   : > { %s189_s10 = sld [smem:[%s459_s7]]   ;;  %s657_s19 = smov 2  }
  0x44   : > { %461 = sst [smem:[#allocation11 + $0x1]] (%p885_p4), %s656_s18  ;;  %s658_s1 = smov 128  }
  0x45   : > { %462 = sst [smem:[#allocation11 + $0x2]] (%p885_p4), %s657_s19  ;;  %s659_s30 = smov 8  }
  0x46   : > { %463 = sst [smem:[#allocation11 + $0x3]] (%p885_p4), %s658_s1  ;;  %s172_s5 = scalar_lea.sflag [#allocation3], %s171_s21 }
  0x47   : > { %464 = sst [smem:[#allocation11 + $0x4]] (%p885_p4), %s658_s1  ;;  %s660_s7 = smov 131072  }
  0x48   : > { %465 = sst [smem:[#allocation11 + $0x5]] (%p885_p4), %s659_s30 }
  0x49   : > { %s441_s24 = sshll.u32 %s189_s10, 26 }
  0x4a   : > { %s442_s4 = sadd.s32 134217728, %s441_s24 }
  0x4b   : > { %466 = dma.general (%p885_p4), %s184_s6, 512, %s198_s9, %s172_s5, %s660_s7, [#allocation11], %s442_s4, 0  }
  0x4c PF: > { %p886_p5 = scmp.ne.s32.totalorder %s882_s29, 0 }
  0x4d   : > { %s807_s8 = sand.u32 (!%p886_p5), 1, %s635_s13   ;;  %p887_p8 = scmp.ne.s32.totalorder (!%p886_p5), %s879_s25, 0 }
  0x4e   : > { %222 = sbr.rel (%p886_p5) target bundleno = 115 (0x73), region = 32  ;;  %s444_s1 = sshll.u32 (!%p886_p5), %s807_s8, 5 }
  0x4f   : > { %s225_s10 = scalar_lea.sflag (!%p886_p5), [#allocation3], %s807_s8  ;;  %s228_s11 = scalar_lea.vmem (!%p886_p5), [#allocation2], %s444_s1 }
  0x53   : > { %614 = dma.done.wait (%p887_p8), %s225_s10, 512  }
  0x54   : > { %616 = vsyncadd (%p887_p8), %s225_s10, 4294966784  ;;  %p888_p9 = scmp.ne.s32.totalorder %s878_s23, 0 }
  0x56   : > { %618 = dma.done.wait (%p888_p9), [#allocation5], 16  }
  0x57   : > { %620 = vsyncadd (%p888_p9), [#allocation5], 4294967280 }
  0x58   : > { %622 = dma.done.wait (%p888_p9), [#allocation8], 16  }
  0x59   : > { %624 = vsyncadd (%p888_p9), [#allocation8], 4294967280 }
  0x5a   : > { %241 = sfence }
  0x5b   : > { %s262_s22 = sld [smem:[#allocation6 + %s643_s15]]  ;;  %v264_v0 = vld [vmem:[%s228_s11] sm:$0xff]  ;;  %v265_v1 = vld [vmem:[%s228_s11 + $0x8] sm:$0xff]  ;;  %v266_v2 = vld [vmem:[%s228_s11 + $0x10] sm:$0xff]  ;;  %vm278_vm0 = vcmask 130048   ;;  %s259_s23 = scalar_lea.vmem [#allocation9], %s444_s1 }
  0x5c   : > { %s263_s29 = sld [smem:[#allocation7 + %s643_s15]]  ;;  %v267_v3 = vld [vmem:[%s228_s11 + $0x18] sm:$0xff]  ;;  %s284_s25 = scalar_lea.sflag [#allocation4], %s807_s8 }
  0x61   : > { %v268_v4 = vstv %s262_s22 }
  0x62   : > { %v269_v5 = vmul.f32 %v268_v4, %v264_v0  ;;  %v273_v6 = vstv %s263_s29  ;;  %v270_v7 = vmul.f32 %v268_v4, %v265_v1  ;;  %v271_v8 = vmul.f32 %v268_v4, %v266_v2 }
  0x63   : > { %v272_v9 = vmul.f32 %v268_v4, %v267_v3 }
  0x64   : > { %v274_v10 = vadd.f32 %v273_v6, %v269_v5  ;;  %v275_v11 = vadd.f32 %v273_v6, %v270_v7  ;;  %v276_v12 = vadd.f32 %v273_v6, %v271_v8 }
  0x65   : > { %v277_v13 = vadd.f32 %v273_v6, %v272_v9 }
  0x66   : > { %279 = vst.msk [vmem:[%s259_s23] sm:$0xff] %vm278_vm0, %v274_v10  ;;  %280 = vst.msk [vmem:[%s259_s23 + $0x8] sm:$0xff] %vm278_vm0, %v275_v11 }
  0x67   : > { %281 = vst.msk [vmem:[%s259_s23 + $0x10] sm:$0xff] %vm278_vm0, %v276_v12  ;;  %282 = vst.msk [vmem:[%s259_s23 + $0x18] sm:$0xff] %vm278_vm0, %v277_v13 }
  0x68   : > { %s454_s21 = sshll.u32 %s643_s15, 8  ;;  %s310_s6 = sshll.u32 %s259_s23, 4  ;;  %s311_s6 = int_to_ptr.vmem [resolvable:$true] %s310_s6 }
  0x69   : > { %s299_s19 = scalar_lea.hbm %s869_s3, %s454_s21  ;;  %s661_s24 = smov 256  }
  0x6a   : > { %p889_p0 = scmp.ne.s32.totalorder %s880_s26, 0  ;;  %s662_s30 = smov 768  }
  0x6b   : > { %s663_s4 = smov 2   ;;  %s664_s5 = smov 128  }
  0x6c   : > { %472 = sst [smem:[#allocation13]] (%p889_p0), %s661_s24  ;;  %s665_s15 = smov 8  }
  0x6d   : > { %473 = sst [smem:[#allocation13 + $0x1]] (%p889_p0), %s662_s30  ;;  %s666_s7 = smov 131072  }
  0x6e   : > { %474 = sst [smem:[#allocation13 + $0x2]] (%p889_p0), %s663_s4  ;;  %s667_s8 = smov 0  }
  0x6f   : > { %475 = sst [smem:[#allocation13 + $0x3]] (%p889_p0), %s664_s5 }
  0x70   : > { %476 = sst [smem:[#allocation13 + $0x4]] (%p889_p0), %s664_s5 }
  0x71   : > { %477 = sst [smem:[#allocation13 + $0x5]] (%p889_p0), %s665_s15 }
  0x72   : > { %478 = dma.general (%p889_p0), %s311_s6, 512, %s299_s19, %s284_s25, %s666_s7, [#allocation13], %s667_s8, 0  }
  0x73 PF: > { %p495_p2 = scmp.ge.s32.totalorder %s651_s17, 2  ;;  %s338_s1 = sand.u32 1, %s631_s12  }
  0x74   : > { %p890_p6 = scmp.ne.s32.totalorder %s881_s28, 0  ;;  %s339_s10 = scalar_lea.sflag [#allocation4], %s338_s1 }
  0x76   : > { %p488_p10 = pnand %p495_p2, %p890_p6 }
  0x78   : > { %p489_p12 = pneg %p488_p10 }
  0x7a   : > { %626 = dma.done.wait (%p489_p12), %s339_s10, 512  }
  0x7b   : > { %628 = vsyncadd (%p489_p12), %s339_s10, 4294966784  ;;  %s21_s17 = sadd.s32 1, %s651_s17   ;;  %s891_s12 = smov %s635_s13 }
  0x7c   : > { %p18_p13 = scmp.ge.s32.totalorder %s21_s17, 5   ;;  %s892_s13 = smov %s639_s14 }
  0x7d   : > { %s893_s14 = smov %s750_s27  ;;  %s894_s15 = smov %s647_s16 }
  0x7e   : > { %s895_s16 = smov %s897_s20  ;;  %20 = sbr.rel (!%p18_p13) target bundleno = 10 (0xa), region = 96 }
  0x83   :  { %344 = vsyncpa [#allocation3], 1 }
  0x84   :  { %346 = vsyncpa [#allocation3 + $0x1], 1 }
  0x85   :  { %347 = vsyncpa [#allocation4], 1 }
  0x86   :  { %349 = vsyncpa [#allocation4 + $0x1], 1 }
  0x87   :  { %350 = vsyncpa [#allocation5], 1 }
  0x88   :  { %352 = vsyncpa [#allocation5 + $0x1], 1 }
  0x89   :  { %353 = vsyncpa [#allocation8], 1 }

</bundles_post_ra>
